<compile_context>
chip_gen: v5e
topology: v5e:2x2
jax: 0.10.0
libtpu: 0.0.40
codegen_flags: <defaults>
</compile_context>

<pallas_src>
import jax
import jax.numpy as jnp
from jax.experimental import pallas as pl
from jax.experimental.pallas import tpu as pltpu

NUM_ITEMS = 9  # len(calorias_dict) in the reference module


def _round_up(n: int, m: int) -> int:
    return ((n + m - 1) // m) * m


def _cdiv(a: int, b: int) -> int:
    return (a + b - 1) // b


def _linear_kernel(w_ref, b_ref, xt_ref, o_ref):
    # xt_ref: (F, bt) VMEM  -- batch on the lane axis (lane-dense)
    # w_ref : (F, 1)  VMEM  -- Linear weight column, lane-broadcast against xt
    # b_ref : (1,)    SMEM  -- scalar bias
    # o_ref : (1, bt) VMEM  -- lane-dense output row (unmasked vst)
    x = xt_ref[...]
    w = w_ref[...]
    # VPU multiply + XLU sublane-axis reduction; the MXU is left untouched.
    acc = jnp.sum(x * w, axis=0, keepdims=True)  # (1, bt), f32
    o_ref[...] = (acc + b_ref[0]).astype(o_ref.dtype)


def modelo_calorias_forward(x, weight, bias, *, block_batch: int = 65536):
    """x: (B, num_items); weight: (1, num_items); bias: (1,) -> (B, 1) f32."""
    x = jnp.asarray(x, jnp.float32)
    weight = jnp.asarray(weight, jnp.float32)
    bias = jnp.asarray(bias, jnp.float32)

    B, F = x.shape
    assert weight.shape == (1, F)

    # Batch-on-lanes layout. Standalone this is one extra HBM pass over x;
    # when fused, the producer should emit (F, B) directly.
    xt = x.T                        # (F, B)
    w_col = weight.reshape(F, 1)    # weight column, lane-broadcast in kernel
    b_vec = bias.reshape(1)         # scalar bias for SMEM

    # Batch tile on the lane axis: multiple of 128, big enough to amortize the
    # ~0.35 us/step pipeline overhead, small enough that double-buffered VMEM
    # (~192 B/row) stays far below every generation's limit, and capped so the
    # grid keeps >= 2 steps when B is large enough (v7x dual-TC sharding).
    bt = min(block_batch, _round_up(B, 128))
    if B > 2 * 128:
        bt = min(bt, _round_up(_cdiv(B, 2), 128))
    bt = max(bt, 128)
    grid = (_cdiv(B, bt),)

    out = pl.pallas_call(
        _linear_kernel,
        out_shape=jax.ShapeDtypeStruct((1, B), jnp.float32),
        grid=grid,
        in_specs=[
            # Weight column: block == full array (F, 1), constant index map ->
            # stays resident in VMEM across all grid steps.
            pl.BlockSpec((F, 1), lambda i: (0, 0)),
            # Scalar bias in SMEM.
            pl.BlockSpec(memory_space=pltpu.MemorySpace.SMEM),
            # x tile: (F, bt). Second-last dim equals the full array dim (F=9),
            # last dim is a multiple of 128 -> satisfies the (8,128) rule.
            # Last block may be ragged; OOB output lanes are masked.
            pl.BlockSpec((F, bt), lambda i: (0, i)),
        ],
        # Lane-dense output row; ragged tail handled by masked stores.
        out_specs=pl.BlockSpec((1, bt), lambda i: (0, i)),
        compiler_params=pltpu.CompilerParams(
            # Batch tiles are independent -> shardable across TCs on v7x.
            dimension_semantics=("parallel",),
            # Explicit scoped-VMEM limit (safe on v5e/v6e/v7x) so larger
            # block_batch values also compile without hitting the 16/32 MiB
            # default scoped limits.
            vmem_limit_bytes=32 * 1024 * 1024,
        ),
    )(w_col, b_vec, xt)

    return out.reshape(B, 1)


if __name__ == "__main__":
    key = jax.random.PRNGKey(0)
    k_x, k_w, k_b, k_x2 = jax.random.split(key, 4)

    # Small shapes consistent with the module: batch of "food item count" rows.
    batch = 8
    x = jax.random.uniform(k_x, (batch, NUM_ITEMS), dtype=jnp.float32)

    # nn.Linear(num_items, 1) parameter shapes: weight (1, F), bias (1,).
    bound = 1.0 / jnp.sqrt(float(NUM_ITEMS))
    weight = jax.random.uniform(
        k_w, (1, NUM_ITEMS), minval=-bound, maxval=bound, dtype=jnp.float32
    )
    bias = jax.random.uniform(
        k_b, (1,), minval=-bound, maxval=bound, dtype=jnp.float32
    )

    out = jax.block_until_ready(modelo_calorias_forward(x, weight, bias))
    ref = x @ weight.T + bias
    assert out.shape == (batch, 1)
    assert jnp.allclose(out, ref, atol=1e-5, rtol=1e-5)

    # Second check: exercises the multi-step grid + ragged last block path
    # (no wrapper-side padding copy).
    batch2 = 1037
    x2 = jax.random.uniform(k_x2, (batch2, NUM_ITEMS), dtype=jnp.float32)
    out2 = jax.block_until_ready(modelo_calorias_forward(x2, weight, bias))
    ref2 = x2 @ weight.T + bias
    assert out2.shape == (batch2, 1)
    assert jnp.allclose(out2, ref2, atol=1e-5, rtol=1e-5)

    print("KERNEL_OK")
</pallas_src>

<mosaic_0001>
module attributes {stable_mosaic.version = 11 : i64} {
  func.func @_linear_kernel(%arg0: i32, %arg1: memref<9x1xf32, #tpu.memory_space<vmem>>, %arg2: memref<1xf32, #tpu.memory_space<smem>>, %arg3: memref<9x128xf32, #tpu.memory_space<vmem>>, %arg4: memref<1x128xf32, #tpu.memory_space<vmem>>) attributes {dimension_semantics = [#tpu.dimension_semantics<parallel>], iteration_bounds = array<i64: 1>, scalar_prefetch = 0 : i64, scratch_operands = 0 : i64, tpu.core_type = #tpu.core_type<tc>, window_params = [{pipeline_mode = #tpu.pipeline_mode<synchronous>, transform_indices = @transform_0, window_bounds = array<i64: 9, 1>}, {transform_indices = @transform_1, window_bounds = array<i64: 1>}, {transform_indices = @transform_2, window_bounds = array<i64: 9, 128>}, {transform_indices = @transform_3, window_bounds = array<i64: 1, 128>}]} {
    %c0 = arith.constant 0 : index
    %c0_0 = arith.constant 0 : index
    %0 = vector.load %arg3[%c0, %c0_0] : memref<9x128xf32, #tpu.memory_space<vmem>>, vector<9x128xf32>
    %c0_1 = arith.constant 0 : index
    %c0_2 = arith.constant 0 : index
    %1 = vector.load %arg1[%c0_1, %c0_2] : memref<9x1xf32, #tpu.memory_space<vmem>>, vector<9x1xf32>
    %2 = vector.broadcast %1 : vector<9x1xf32> to vector<9x128xf32>
    %3 = arith.mulf %0, %2 : vector<9x128xf32>
    %cst = arith.constant dense<0.000000e+00> : vector<128xf32>
    %4 = vector.multi_reduction <add>, %3, %cst [0] : vector<9x128xf32> to vector<128xf32>
    %5 = vector.shape_cast %4 : vector<128xf32> to vector<1x128xf32>
    %c0_3 = arith.constant 0 : index
    %6 = memref.load %arg2[%c0_3] : memref<1xf32, #tpu.memory_space<smem>>
    %7 = vector.broadcast %6 : f32 to vector<1x128xf32>
    %8 = arith.addf %5, %7 : vector<1x128xf32>
    %c0_4 = arith.constant 0 : index
    %c0_5 = arith.constant 0 : index
    %9 = vector.load %arg4[%c0_4, %c0_5] : memref<1x128xf32, #tpu.memory_space<vmem>>, vector<1x128xf32>
    tpu.vector_store %arg4[%c0_4, %c0_5], %8 {strides = array<i32>} : memref<1x128xf32, #tpu.memory_space<vmem>>, vector<1x128xf32>,
    return
  }
  func.func @transform_0(%arg0: i32) -> (i32, i32) {
    %c0_i32 = arith.constant 0 : i32
    %c0_i32_0 = arith.constant 0 : i32
    %c0_i32_1 = arith.constant 0 : i32
    return %c0_i32, %c0_i32_0 : i32, i32
  }
  func.func @transform_1(%arg0: i32) -> i32 {
    %c0_i32 = arith.constant 0 : i32
    %c0_i32_0 = arith.constant 0 : i32
    return %c0_i32 : i32
  }
  func.func @transform_2(%arg0: i32) -> (i32, i32) {
    %c0_i32 = arith.constant 0 : i32
    %c0_i32_0 = arith.constant 0 : i32
    return %c0_i32, %arg0 : i32, i32
  }
  func.func @transform_3(%arg0: i32) -> (i32, i32) {
    %c0_i32 = arith.constant 0 : i32
    %c0_i32_0 = arith.constant 0 : i32
    return %c0_i32, %arg0 : i32, i32
  }
}

</mosaic_0001>

<bundles_post_ra>
// kernel: tpu_custom_call.1
= control target key start
LH: loop header
LB: loop body
LE: loop exit
PB: predicated region body
PF: predicated region fallthrough
CT: control target
= control target key end

     0   :  { %v90_v1 = vmov 0   ;;  %s130_s0 = inlined_call_operand.vmem [shape: f32[9,1], index: 0, kind: input, shape index: {}]   ;;  %s131_s1 = inlined_call_operand.<no memory space> [shape: f32[1], index: 1, kind: input, shape index: {}]   ;;  %s132_s2 = inlined_call_operand.vmem [shape: f32[9,8], index: 2, kind: input, shape index: {}]   ;;  %s133_s3 = inlined_call_operand.hbm [shape: f32[1,8], index: 3, kind: output, shape index: {}]  }
   0x1   :  { %v19_v0 = vld [vmem:[%s130_s0 + $0x8] sm:$0x1]  ;;  %63 = vset.pattern.permute.xlu0 %v90_v1 }
   0x2   :  { %9 = vsyncpa [#allocation4], 0  ;;  %27 = vperm.xlu0 %63, %v19_v0   ;;  %v18_v2 = vld [vmem:[%s130_s0] sm:$0xff]  ;;  %v17_v4 = vld [vmem:[%s132_s2 + $0x8] sm:$0x1]  ;;  %vm32_vm0 = vcmask 1040384   ;;  %v42_v16 = vstv %s131_s1 }
   0x3   :  { %v16_v6 = vld [vmem:[%s132_s2] sm:$0xff]  ;;  %s91_s21 = smov [#allocation3]   ;;  %s52_s2 = sshll.u32 %s133_s3, 4  ;;  %s53_s2 = int_to_ptr.hbm [resolvable:$true] %s52_s2 }
   0x4   :  { %s50_s22 = sshll.u32 %s91_s21, 4  ;;  %s51_s22 = int_to_ptr.vmem [resolvable:$true] %s50_s22 }
   0xa   :  { %22 = vperm.xlu0 %63, %v18_v2  }
  0x74   :  { %v28_v3 = vpop.permute.xlu0 %27 }
  0x75   :  { %v31_v5 = vmul.f32 %v28_v3, %v17_v4 }
  0x77   :  { %v33_v9 = vsel %vm32_vm0, %v31_v5, 0.0 }
  0x7c   :  { %v23_v7 = vpop.permute.xlu0 %22 }
  0x7d   :  { %v30_v8 = vmul.f32 %v23_v7, %v16_v6 }
  0x7f   :  { %v34_v10 = vadd.f32 %v33_v9, %v30_v8 }
  0x81   :  { %v35_v11 = vrot.slane %v34_v10, 4 }
  0x83   :  { %v36_v12 = vadd.f32 %v35_v11, %v34_v10 }
  0x85   :  { %v37_v13 = vrot.slane %v36_v12, 2 }
  0x87   :  { %v38_v14 = vadd.f32 %v37_v13, %v36_v12 }
  0x89   :  { %v39_v15 = vrot.slane %v38_v14, 1 }
  0x8b   :  { %v40_v17 = vadd.f32 %v39_v15, %v38_v14 }
  0x8d   :  { %v43_v18 = vadd.f32 %v42_v16, %v40_v17 }
  0x8f   :  { %44 = vst [vmem:[#allocation3] sm:$0x1] %v43_v18 }
  0x90   :  { %55 = dma.vmem_to_hbm [thread:$0]  %s51_s22, 16, %s53_s2, [#allocation4]  }
  0x91   :  { %88 = dma.done.wait [#allocation4], 16  }
  0x92   :  { %89 = vsyncadd [#allocation4], 4294967280 }
  0x93   :  { %60 = vsyncpa [#allocation4], 1 }

</bundles_post_ra>
